<compile_context>
chip_gen: v5e
topology: v5e:2x2
jax: 0.10.0
libtpu: 0.0.40
codegen_flags: <defaults>
</compile_context>

<pallas_src>
import numpy as np
import jax
import jax.numpy as jnp
from jax import lax
from jax.experimental import pallas as pl
from jax.experimental.pallas import tpu as pltpu


# ---------------------------------------------------------------------------
# Kernel
# ---------------------------------------------------------------------------
def _make_kernel(W, lane, downsampling):
    """W: image width.  lane: imgs_per_step * H * W (lanes per grid step)."""

    def kernel(x_ref, mask_ref, w1_ref, w2_ref, w3_ref,
               sh1_ref, sh2_ref, sh3_ref, out_ref):
        x = x_ref[...]                                   # (Cin, L) f32
        x_bf = x.astype(jnp.bfloat16)

        # conv1 (1x1): scale folded into w1 rows -> add shift -> ReLU.
        h1 = jnp.dot(w1_ref[...], x_bf, preferred_element_type=jnp.float32)
        h1 = jnp.maximum(h1 + sh1_ref[...], 0.0)         # (P_pad, L) f32

        # conv2 (3x3, stride=1, pad=1): 9 lane-rolled taps, boundary-masked
        # with the precomputed masks, stacked into a sublane-aligned
        # (9*P_pad, L) bf16 slab and fed to ONE deep-K matmul.
        masks = mask_ref[...]                            # (8, L) f32 {0,1}
        h1_bf = h1.astype(jnp.bfloat16)
        taps = []
        m = 0
        for di in range(3):
            for dj in range(3):
                if di == 1 and dj == 1:
                    taps.append(h1_bf)
                    continue
                off = (di - 1) * W + (dj - 1)            # flat source offset
                shifted = pltpu.roll(h1, shift=(-off) % lane, axis=1)
                taps.append((shifted * masks[m:m + 1]).astype(jnp.bfloat16))
                m += 1
        slab = jnp.concatenate(taps, axis=0)             # (9*P_pad, L) bf16

        h2 = jnp.dot(w2_ref[...], slab, preferred_element_type=jnp.float32)
        h2 = jnp.maximum(h2 + sh2_ref[...], 0.0)         # (P_pad, L) f32

        # conv3 (1x1) fused with the downsample 1x1 conv (one matmul,
        # K = P_pad + Cin) on the downsampling path; identity path adds the
        # f32 residual directly.
        if downsampling:
            rhs = jnp.concatenate([h2, x], axis=0).astype(jnp.bfloat16)
            out = jnp.dot(w3_ref[...], rhs, preferred_element_type=jnp.float32)
            out = out + sh3_ref[...]
        else:
            out = jnp.dot(w3_ref[...], h2.astype(jnp.bfloat16),
                          preferred_element_type=jnp.float32)
            out = out + sh3_ref[...] + x
        out_ref[...] = jnp.maximum(out, 0.0).astype(out_ref.dtype)

    return kernel


def _boundary_masks(H, W, imgs_per_step):
    """(8, imgs_per_step*H*W) f32 {0,1} masks for the 8 non-center 3x3 taps."""
    hw = H * W
    rows = np.arange(hw) // W
    cols = np.arange(hw) % W
    ms = []
    for di in range(3):
        for dj in range(3):
            if di == 1 and dj == 1:
                continue
            r = rows + (di - 1)
            c = cols + (dj - 1)
            ms.append((r >= 0) & (r < H) & (c >= 0) & (c < W))
    mask = np.stack(ms).astype(np.float32)               # (8, HW)
    mask = np.tile(mask, (1, imgs_per_step))             # (8, L)
    return jnp.asarray(mask)


# ---------------------------------------------------------------------------
# Wrapper
# ---------------------------------------------------------------------------
def bottleneck_forward(x_nchw, kp, downsampling, imgs_per_step=None):
    """x_nchw: (N, Cin, H, W) f32.  kp: kernel params (see kernel_params)."""
    N, Cin, H, W = x_nchw.shape
    HW = H * W
    Cout = kp["sh3"].shape[0]
    if not downsampling:
        assert Cin == Cout, "identity residual needs in_places == 4*places"

    if imgs_per_step is None:
        # Pack images onto lanes, but keep >= 2 parallel grid steps so both
        # v7x TensorCores get work.
        imgs_per_step = max(1, N // 2)
    assert N % imgs_per_step == 0
    lane = imgs_per_step * HW
    n_steps = N // imgs_per_step

    # Lane-pack the batch: (N, Cin, H, W) -> (Cin, N*HW).
    x_t = jnp.transpose(x_nchw.reshape(N, Cin, HW), (1, 0, 2)).reshape(Cin, N * HW)
    masks = _boundary_masks(H, W, imgs_per_step)

    def const_spec(a):
        nd = a.ndim
        return pl.BlockSpec(a.shape, lambda n, _nd=nd: (0,) * _nd)

    args = [x_t, masks, kp["w1"], kp["w2"], kp["w3"],
            kp["sh1"], kp["sh2"], kp["sh3"]]
    in_specs = [pl.BlockSpec((Cin, lane), lambda n: (0, n))]
    in_specs += [const_spec(a) for a in args[1:]]

    out_t = pl.pallas_call(
        _make_kernel(W, lane, downsampling),
        out_shape=jax.ShapeDtypeStruct((Cout, N * HW), jnp.float32),
        grid_spec=pltpu.PrefetchScalarGridSpec(
            num_scalar_prefetch=0,
            grid=(n_steps,),
            in_specs=in_specs,
            out_specs=pl.BlockSpec((Cout, lane), lambda n: (0, n)),
        ),
        compiler_params=pltpu.CompilerParams(
            dimension_semantics=("parallel",),
            vmem_limit_bytes=48 * 1024 * 1024),
    )(*args)

    return out_t.reshape(Cout, N, HW).transpose(1, 0, 2).reshape(N, Cout, H, W)


# ---------------------------------------------------------------------------
# Parameter construction / folding
# ---------------------------------------------------------------------------
def fold_alpha_bn(alpha, gamma, beta, mean, var, eps=1e-5):
    """Fold per-filter alpha and BatchNorm (inference) into scale/shift."""
    inv = gamma / jnp.sqrt(var + eps)
    scale = (alpha * inv).astype(jnp.float32)
    shift = (beta - mean * inv).astype(jnp.float32)
    return scale, shift


def make_params(key, in_places, places, downsampling):
    """Full-precision module parameters (OIHW conv weights + folded scale/shift)."""
    expansion = 4
    cout = places * expansion
    keys = iter(jax.random.split(key, 32))

    def bn(c):
        gamma = 0.5 + jax.random.uniform(next(keys), (c,))
        beta = 0.1 * jax.random.normal(next(keys), (c,))
        mean = 0.1 * jax.random.normal(next(keys), (c,))
        var = 0.5 + jax.random.uniform(next(keys), (c,))
        return gamma, beta, mean, var

    w1 = 0.2 * jax.random.normal(next(keys), (places, in_places, 1, 1))
    a1 = jax.random.uniform(next(keys), (places,))
    w2 = 0.2 * jax.random.normal(next(keys), (places, places, 3, 3))
    a2 = jax.random.uniform(next(keys), (places,))
    w3 = 0.2 * jax.random.normal(next(keys), (cout, places, 1, 1))
    a3 = jax.random.uniform(next(keys), (cout,))

    sc1, sh1 = fold_alpha_bn(a1, *bn(places))
    sc2, sh2 = fold_alpha_bn(a2, *bn(places))
    sc3, sh3 = fold_alpha_bn(a3, *bn(cout))

    p = dict(w1_oihw=w1.astype(jnp.float32), w2_oihw=w2.astype(jnp.float32),
             w3_oihw=w3.astype(jnp.float32),
             sc1=sc1, sh1=sh1, sc2=sc2, sh2=sh2, sc3=sc3, sh3=sh3)
    if downsampling:
        wd = 0.2 * jax.random.normal(next(keys), (cout, in_places, 1, 1))
        scd, shd = fold_alpha_bn(jnp.ones((cout,)), *bn(cout))
        p.update(wd_oihw=wd.astype(jnp.float32), scd=scd, shd=shd)
    else:
        assert in_places == cout, "identity residual needs in_places == 4*places"
    return p


def kernel_params(p, downsampling):
    """Kernel layout: scales folded into bf16 weights, P padded to 8-aligned rows,
    conv3/downsample fused, (C, 1) f32 shifts."""
    P, Cin = p["w1_oihw"].shape[:2]
    Cout = p["w3_oihw"].shape[0]
    P_pad = ((P + 7) // 8) * 8
    pad_p = P_pad - P

    # conv1: fold sc1 into rows, pad output channels to P_pad (zeros).
    w1 = p["w1_oihw"][:, :, 0, 0] * p["sc1"][:, None]                    # (P, Cin)
    w1 = jnp.pad(w1, ((0, pad_p), (0, 0))).astype(jnp.bfloat16)          # (P_pad, Cin)
    sh1 = jnp.pad(p["sh1"], (0, pad_p)).reshape(P_pad, 1)

    # conv2: OIHW -> (O, kh, kw, I); pad I to P_pad so each of the 9 taps is
    # sublane-aligned in the slab; fold sc2 into rows; pad O to P_pad.
    w2 = jnp.transpose(p["w2_oihw"], (0, 2, 3, 1))                       # (P,3,3,P)
    w2 = jnp.pad(w2, ((0, 0), (0, 0), (0, 0), (0, pad_p)))               # (P,3,3,P_pad)
    w2 = w2.reshape(P, 9 * P_pad) * p["sc2"][:, None]
    w2 = jnp.pad(w2, ((0, pad_p), (0, 0))).astype(jnp.bfloat16)          # (P_pad, 9*P_pad)
    sh2 = jnp.pad(p["sh2"], (0, pad_p)).reshape(P_pad, 1)

    # conv3: fold sc3 into rows, pad K to P_pad; on the downsampling path fuse
    # the downsample conv (scaled by scd) and its shift into the same matmul.
    w3 = p["w3_oihw"][:, :, 0, 0] * p["sc3"][:, None]                    # (Cout, P)
    w3 = jnp.pad(w3, ((0, 0), (0, pad_p)))                               # (Cout, P_pad)
    sh3 = p["sh3"].reshape(Cout, 1)
    if downsampling:
        wd = p["wd_oihw"][:, :, 0, 0] * p["scd"][:, None]                # (Cout, Cin)
        w3 = jnp.concatenate([w3, wd], axis=1)                           # (Cout, P_pad+Cin)
        sh3 = sh3 + p["shd"].reshape(Cout, 1)
    w3 = w3.astype(jnp.bfloat16)

    return dict(w1=w1, w2=w2, w3=w3,
                sh1=sh1.astype(jnp.float32),
                sh2=sh2.astype(jnp.float32),
                sh3=sh3.astype(jnp.float32))


# ---------------------------------------------------------------------------
# Reference (pure JAX, same scale-folded bf16-operand / f32-accumulate numerics)
# ---------------------------------------------------------------------------
def ref_forward(x, p, downsampling):
    dn = ("NCHW", "OIHW", "NCHW")

    def conv(inp, w, sc, padding):
        w_sc = (w * sc.reshape(-1, 1, 1, 1)).astype(jnp.bfloat16)
        return lax.conv_general_dilated(
            inp.astype(jnp.bfloat16), w_sc, (1, 1), padding,
            dimension_numbers=dn, preferred_element_type=jnp.float32)

    def shift(y, sh):
        return y + sh.reshape(1, -1, 1, 1)

    h1 = jax.nn.relu(shift(conv(x, p["w1_oihw"], p["sc1"], "VALID"), p["sh1"]))
    h2 = jax.nn.relu(shift(conv(h1, p["w2_oihw"], p["sc2"], "SAME"), p["sh2"]))
    h3 = shift(conv(h2, p["w3_oihw"], p["sc3"], "VALID"), p["sh3"])
    if downsampling:
        res = shift(conv(x, p["wd_oihw"], p["scd"], "VALID"), p["shd"])
    else:
        res = x
    return jax.nn.relu(h3 + res)


# ---------------------------------------------------------------------------
# Test harness
# ---------------------------------------------------------------------------
def _run_case(key, N, in_places, places, H, W, downsampling, imgs_per_step=None):
    kx, kw = jax.random.split(key)
    x = jax.random.normal(kx, (N, in_places, H, W), dtype=jnp.float32)
    params = make_params(kw, in_places=in_places, places=places,
                         downsampling=downsampling)
    kp = kernel_params(params, downsampling)

    out = jax.block_until_ready(
        bottleneck_forward(x, kp, downsampling, imgs_per_step=imgs_per_step))
    ref = jax.block_until_ready(ref_forward(x, params, downsampling))

    assert out.shape == (N, places * 4, H, W), out.shape
    err = float(jnp.max(jnp.abs(out - ref)))
    assert jnp.allclose(out, ref, atol=5e-3, rtol=5e-3), err
    return err


if __name__ == "__main__":
    key = jax.random.PRNGKey(0)
    k1, k2 = jax.random.split(key)

    # downsampling block: Bottleneck(in_places=8, places=4, downsampling=True)
    # N=2 -> imgs_per_step=1, grid=(2,) (two parallel steps).
    _run_case(k1, N=2, in_places=8, places=4, H=16, W=16, downsampling=True)

    # identity block (fast path): Bottleneck(in_places=16, places=4)
    # N=4 -> imgs_per_step=2, grid=(2,): exercises lane-packing of 2 images
    # per step (cross-image roll wrap handled by the boundary masks).
    _run_case(k2, N=4, in_places=16, places=4, H=16, W=16, downsampling=False)

    print("KERNEL_OK")
</pallas_src>

<mosaic_0001>
module attributes {stable_mosaic.version = 11 : i64} {
  func.func @kernel(%arg0: i32, %arg1: memref<8x256xf32, #tpu.memory_space<vmem>>, %arg2: memref<8x256xf32, #tpu.memory_space<vmem>>, %arg3: memref<8x8xbf16, #tpu.memory_space<vmem>>, %arg4: memref<8x72xbf16, #tpu.memory_space<vmem>>, %arg5: memref<16x16xbf16, #tpu.memory_space<vmem>>, %arg6: memref<8x1xf32, #tpu.memory_space<vmem>>, %arg7: memref<8x1xf32, #tpu.memory_space<vmem>>, %arg8: memref<16x1xf32, #tpu.memory_space<vmem>>, %arg9: memref<16x256xf32, #tpu.memory_space<vmem>>) attributes {dimension_semantics = [#tpu.dimension_semantics<parallel>], iteration_bounds = array<i64: 2>, scalar_prefetch = 0 : i64, scratch_operands = 0 : i64, tpu.core_type = #tpu.core_type<tc>, window_params = [{transform_indices = @transform_0, window_bounds = array<i64: 8, 256>}, {pipeline_mode = #tpu.pipeline_mode<synchronous>, transform_indices = @transform_1, window_bounds = array<i64: 8, 256>}, {pipeline_mode = #tpu.pipeline_mode<synchronous>, transform_indices = @transform_2, window_bounds = array<i64: 8, 8>}, {pipeline_mode = #tpu.pipeline_mode<synchronous>, transform_indices = @transform_3, window_bounds = array<i64: 8, 72>}, {pipeline_mode = #tpu.pipeline_mode<synchronous>, transform_indices = @transform_4, window_bounds = array<i64: 16, 16>}, {pipeline_mode = #tpu.pipeline_mode<synchronous>, transform_indices = @transform_5, window_bounds = array<i64: 8, 1>}, {pipeline_mode = #tpu.pipeline_mode<synchronous>, transform_indices = @transform_6, window_bounds = array<i64: 8, 1>}, {pipeline_mode = #tpu.pipeline_mode<synchronous>, transform_indices = @transform_7, window_bounds = array<i64: 16, 1>}, {transform_indices = @transform_8, window_bounds = array<i64: 16, 256>}]} {
    %c0 = arith.constant 0 : index
    %c0_0 = arith.constant 0 : index
    %0 = vector.load %arg1[%c0, %c0_0] : memref<8x256xf32, #tpu.memory_space<vmem>>, vector<8x256xf32>
    %1 = arith.truncf %0 : vector<8x256xf32> to vector<8x256xbf16>
    %c0_1 = arith.constant 0 : index
    %c0_2 = arith.constant 0 : index
    %2 = vector.load %arg3[%c0_1, %c0_2] : memref<8x8xbf16, #tpu.memory_space<vmem>>, vector<8x8xbf16>
    %cst = arith.constant dense<0.000000e+00> : vector<8x256xf32>
    %3 = tpu.matmul %2, %1, %cst {dimension_numbers = #tpu.dot_dimension_numbers<[1], [0], [0], [1], [0, 0, 1, 1], [], []>} : vector<8x8xbf16>, vector<8x256xbf16>, vector<8x256xf32> -> vector<8x256xf32>
    %c0_3 = arith.constant 0 : index
    %c0_4 = arith.constant 0 : index
    %4 = vector.load %arg6[%c0_3, %c0_4] : memref<8x1xf32, #tpu.memory_space<vmem>>, vector<8x1xf32>
    %5 = vector.broadcast %4 : vector<8x1xf32> to vector<8x256xf32>
    %6 = arith.addf %3, %5 : vector<8x256xf32>
    %cst_5 = arith.constant 0.000000e+00 : f32
    %7 = vector.broadcast %cst_5 : f32 to vector<8x256xf32>
    %8 = arith.maximumf %6, %7 : vector<8x256xf32>
    %c0_6 = arith.constant 0 : index
    %c0_7 = arith.constant 0 : index
    %9 = vector.load %arg2[%c0_6, %c0_7] : memref<8x256xf32, #tpu.memory_space<vmem>>, vector<8x256xf32>
    %10 = arith.truncf %8 : vector<8x256xf32> to vector<8x256xbf16>
    %c17_i32 = arith.constant 17 : i32
    %11 = tpu.dynamic_rotate %8 by %c17_i32 dim 1 : vector<8x256xf32>, i32 -> vector<8x256xf32>
    %12 = vector.extract_strided_slice %9 {offsets = [0, 0], sizes = [1, 256], strides = [1, 1]} : vector<8x256xf32> to vector<1x256xf32>
    %13 = vector.broadcast %12 : vector<1x256xf32> to vector<8x256xf32>
    %14 = arith.mulf %11, %13 : vector<8x256xf32>
    %15 = arith.truncf %14 : vector<8x256xf32> to vector<8x256xbf16>
    %c16_i32 = arith.constant 16 : i32
    %16 = tpu.dynamic_rotate %8 by %c16_i32 dim 1 : vector<8x256xf32>, i32 -> vector<8x256xf32>
    %17 = vector.extract_strided_slice %9 {offsets = [1, 0], sizes = [1, 256], strides = [1, 1]} : vector<8x256xf32> to vector<1x256xf32>
    %18 = vector.broadcast %17 : vector<1x256xf32> to vector<8x256xf32>
    %19 = arith.mulf %16, %18 : vector<8x256xf32>
    %20 = arith.truncf %19 : vector<8x256xf32> to vector<8x256xbf16>
    %c15_i32 = arith.constant 15 : i32
    %21 = tpu.dynamic_rotate %8 by %c15_i32 dim 1 : vector<8x256xf32>, i32 -> vector<8x256xf32>
    %22 = vector.extract_strided_slice %9 {offsets = [2, 0], sizes = [1, 256], strides = [1, 1]} : vector<8x256xf32> to vector<1x256xf32>
    %23 = vector.broadcast %22 : vector<1x256xf32> to vector<8x256xf32>
    %24 = arith.mulf %21, %23 : vector<8x256xf32>
    %25 = arith.truncf %24 : vector<8x256xf32> to vector<8x256xbf16>
    %c1_i32 = arith.constant 1 : i32
    %26 = tpu.dynamic_rotate %8 by %c1_i32 dim 1 : vector<8x256xf32>, i32 -> vector<8x256xf32>
    %27 = vector.extract_strided_slice %9 {offsets = [3, 0], sizes = [1, 256], strides = [1, 1]} : vector<8x256xf32> to vector<1x256xf32>
    %28 = vector.broadcast %27 : vector<1x256xf32> to vector<8x256xf32>
    %29 = arith.mulf %26, %28 : vector<8x256xf32>
    %30 = arith.truncf %29 : vector<8x256xf32> to vector<8x256xbf16>
    %c255_i32 = arith.constant 255 : i32
    %31 = tpu.dynamic_rotate %8 by %c255_i32 dim 1 : vector<8x256xf32>, i32 -> vector<8x256xf32>
    %32 = vector.extract_strided_slice %9 {offsets = [4, 0], sizes = [1, 256], strides = [1, 1]} : vector<8x256xf32> to vector<1x256xf32>
    %33 = vector.broadcast %32 : vector<1x256xf32> to vector<8x256xf32>
    %34 = arith.mulf %31, %33 : vector<8x256xf32>
    %35 = arith.truncf %34 : vector<8x256xf32> to vector<8x256xbf16>
    %c241_i32 = arith.constant 241 : i32
    %36 = tpu.dynamic_rotate %8 by %c241_i32 dim 1 : vector<8x256xf32>, i32 -> vector<8x256xf32>
    %37 = vector.extract_strided_slice %9 {offsets = [5, 0], sizes = [1, 256], strides = [1, 1]} : vector<8x256xf32> to vector<1x256xf32>
    %38 = vector.broadcast %37 : vector<1x256xf32> to vector<8x256xf32>
    %39 = arith.mulf %36, %38 : vector<8x256xf32>
    %40 = arith.truncf %39 : vector<8x256xf32> to vector<8x256xbf16>
    %c240_i32 = arith.constant 240 : i32
    %41 = tpu.dynamic_rotate %8 by %c240_i32 dim 1 : vector<8x256xf32>, i32 -> vector<8x256xf32>
    %42 = vector.extract_strided_slice %9 {offsets = [6, 0], sizes = [1, 256], strides = [1, 1]} : vector<8x256xf32> to vector<1x256xf32>
    %43 = vector.broadcast %42 : vector<1x256xf32> to vector<8x256xf32>
    %44 = arith.mulf %41, %43 : vector<8x256xf32>
    %45 = arith.truncf %44 : vector<8x256xf32> to vector<8x256xbf16>
    %c239_i32 = arith.constant 239 : i32
    %46 = tpu.dynamic_rotate %8 by %c239_i32 dim 1 : vector<8x256xf32>, i32 -> vector<8x256xf32>
    %47 = vector.extract_strided_slice %9 {offsets = [7, 0], sizes = [1, 256], strides = [1, 1]} : vector<8x256xf32> to vector<1x256xf32>
    %48 = vector.broadcast %47 : vector<1x256xf32> to vector<8x256xf32>
    %49 = arith.mulf %46, %48 : vector<8x256xf32>
    %50 = arith.truncf %49 : vector<8x256xf32> to vector<8x256xbf16>
    %51 = tpu.concatenate %15, %20, %25, %30, %10, %35, %40, %45, %50 in 0 : vector<8x256xbf16>, vector<8x256xbf16>, vector<8x256xbf16>, vector<8x256xbf16>, vector<8x256xbf16>, vector<8x256xbf16>, vector<8x256xbf16>, vector<8x256xbf16>, vector<8x256xbf16> -> vector<72x256xbf16>
    %c0_8 = arith.constant 0 : index
    %c0_9 = arith.constant 0 : index
    %52 = vector.load %arg4[%c0_8, %c0_9] : memref<8x72xbf16, #tpu.memory_space<vmem>>, vector<8x72xbf16>
    %cst_10 = arith.constant dense<0.000000e+00> : vector<8x256xf32>
    %53 = tpu.matmul %52, %51, %cst_10 {dimension_numbers = #tpu.dot_dimension_numbers<[1], [0], [0], [1], [0, 0, 1, 1], [], []>} : vector<8x72xbf16>, vector<72x256xbf16>, vector<8x256xf32> -> vector<8x256xf32>
    %c0_11 = arith.constant 0 : index
    %c0_12 = arith.constant 0 : index
    %54 = vector.load %arg7[%c0_11, %c0_12] : memref<8x1xf32, #tpu.memory_space<vmem>>, vector<8x1xf32>
    %55 = vector.broadcast %54 : vector<8x1xf32> to vector<8x256xf32>
    %56 = arith.addf %53, %55 : vector<8x256xf32>
    %cst_13 = arith.constant 0.000000e+00 : f32
    %57 = vector.broadcast %cst_13 : f32 to vector<8x256xf32>
    %58 = arith.maximumf %56, %57 : vector<8x256xf32>
    %59 = tpu.concatenate %58, %0 in 0 : vector<8x256xf32>, vector<8x256xf32> -> vector<16x256xf32>
    %60 = arith.truncf %59 : vector<16x256xf32> to vector<16x256xbf16>
    %c0_14 = arith.constant 0 : index
    %c0_15 = arith.constant 0 : index
    %61 = vector.load %arg5[%c0_14, %c0_15] : memref<16x16xbf16, #tpu.memory_space<vmem>>, vector<16x16xbf16>
    %cst_16 = arith.constant dense<0.000000e+00> : vector<16x256xf32>
    %62 = tpu.matmul %61, %60, %cst_16 {dimension_numbers = #tpu.dot_dimension_numbers<[1], [0], [0], [1], [0, 0, 1, 1], [], []>} : vector<16x16xbf16>, vector<16x256xbf16>, vector<16x256xf32> -> vector<16x256xf32>
    %c0_17 = arith.constant 0 : index
    %c0_18 = arith.constant 0 : index
    %63 = vector.load %arg8[%c0_17, %c0_18] : memref<16x1xf32, #tpu.memory_space<vmem>>, vector<16x1xf32>
    %64 = vector.broadcast %63 : vector<16x1xf32> to vector<16x256xf32>
    %65 = arith.addf %62, %64 : vector<16x256xf32>
    %cst_19 = arith.constant 0.000000e+00 : f32
    %66 = vector.broadcast %cst_19 : f32 to vector<16x256xf32>
    %67 = arith.maximumf %65, %66 : vector<16x256xf32>
    %c0_20 = arith.constant 0 : index
    %c0_21 = arith.constant 0 : index
    %68 = vector.load %arg9[%c0_20, %c0_21] : memref<16x256xf32, #tpu.memory_space<vmem>>, vector<16x256xf32>
    tpu.vector_store %arg9[%c0_20, %c0_21], %67 {strides = array<i32>} : memref<16x256xf32, #tpu.memory_space<vmem>>, vector<16x256xf32>,
    return
  }
  func.func @transform_0(%arg0: i32) -> (i32, i32) {
    %c0_i32 = arith.constant 0 : i32
    %c0_i32_0 = arith.constant 0 : i32
    return %c0_i32, %arg0 : i32, i32
  }
  func.func @transform_1(%arg0: i32) -> (i32, i32) {
    %c0_i32 = arith.constant 0 : i32
    %c0_i32_0 = arith.constant 0 : i32
    %c0_i32_1 = arith.constant 0 : i32
    return %c0_i32, %c0_i32_0 : i32, i32
  }
  func.func @transform_2(%arg0: i32) -> (i32, i32) {
    %c0_i32 = arith.constant 0 : i32
    %c0_i32_0 = arith.constant 0 : i32
    %c0_i32_1 = arith.constant 0 : i32
    return %c0_i32, %c0_i32_0 : i32, i32
  }
  func.func @transform_3(%arg0: i32) -> (i32, i32) {
    %c0_i32 = arith.constant 0 : i32
    %c0_i32_0 = arith.constant 0 : i32
    %c0_i32_1 = arith.constant 0 : i32
    return %c0_i32, %c0_i32_0 : i32, i32
  }
  func.func @transform_4(%arg0: i32) -> (i32, i32) {
    %c0_i32 = arith.constant 0 : i32
    %c0_i32_0 = arith.constant 0 : i32
    %c0_i32_1 = arith.constant 0 : i32
    return %c0_i32, %c0_i32_0 : i32, i32
  }
  func.func @transform_5(%arg0: i32) -> (i32, i32) {
    %c0_i32 = arith.constant 0 : i32
    %c0_i32_0 = arith.constant 0 : i32
    %c0_i32_1 = arith.constant 0 : i32
    return %c0_i32, %c0_i32_0 : i32, i32
  }
  func.func @transform_6(%arg0: i32) -> (i32, i32) {
    %c0_i32 = arith.constant 0 : i32
    %c0_i32_0 = arith.constant 0 : i32
    %c0_i32_1 = arith.constant 0 : i32
    return %c0_i32, %c0_i32_0 : i32, i32
  }
  func.func @transform_7(%arg0: i32) -> (i32, i32) {
    %c0_i32 = arith.constant 0 : i32
    %c0_i32_0 = arith.constant 0 : i32
    %c0_i32_1 = arith.constant 0 : i32
    return %c0_i32, %c0_i32_0 : i32, i32
  }
  func.func @transform_8(%arg0: i32) -> (i32, i32) {
    %c0_i32 = arith.constant 0 : i32
    %c0_i32_0 = arith.constant 0 : i32
    return %c0_i32, %arg0 : i32, i32
  }
}

</mosaic_0001>

<bundles_post_ra>
// kernel: tpu_custom_call.1
= control target key start
LH: loop header
LB: loop body
LE: loop exit
PB: predicated region body
PF: predicated region fallthrough
CT: control target
= control target key end

     0   :  { %13 = vsyncpa [#allocation3], 0  ;;  %s1209_s0 = inlined_call_operand.hbm [shape: f32[8,512], index: 0, kind: input, shape index: {}]   ;;  %s1210_s1 = inlined_call_operand.vmem [shape: f32[8,256], index: 1, kind: input, shape index: {}]   ;;  %s1211_s2 = inlined_call_operand.vmem [shape: bf16[8,8], index: 2, kind: input, shape index: {}]   ;;  %s1212_s3 = inlined_call_operand.vmem [shape: bf16[8,72], index: 3, kind: input, shape index: {}]   ;;  %s1213_s4 = inlined_call_operand.vmem [shape: bf16[16,16], index: 4, kind: input, shape index: {}]   ;;  %s1214_s5 = inlined_call_operand.vmem [shape: f32[8,1], index: 5, kind: input, shape index: {}]   ;;  %s1215_s6 = inlined_call_operand.vmem [shape: f32[8,1], index: 6, kind: input, shape index: {}]   ;;  %s1216_s7 = inlined_call_operand.vmem [shape: f32[16,1], index: 7, kind: input, shape index: {}]   ;;  %s1217_s8 = inlined_call_operand.hbm [shape: f32[16,512], index: 8, kind: output, shape index: {}]  }
   0x1   :  { %15 = vsyncpa [#allocation3 + $0x1], 0 }
   0x2   :  { %16 = vsyncpa [#allocation4], 0 }
   0x3   :  { %18 = vsyncpa [#allocation4 + $0x1], 0  ;;  %s991_s27 = smov 0   ;;  %s993_s28 = smov 0  }
   0x4   :  { %s995_s29 = smov 0   ;;  %s997_s30 = smov 0  }
   0x5 LB: > { %1219 = sst [smem:[#allocation8_spill]] %s929_s29  ;;  %s1012_s9 = sadd.s32 4294967295, %s933_s30   ;;  %s933_s30 = sphi %s997_s30, %s1231_s30   ;;  %s929_s29 = sphi %s995_s29, %s1228_s29   ;;  %s925_s28 = sphi %s993_s28, %s1230_s28   ;;  %s921_s27 = sphi %s991_s27, %s1229_s27  }
   0x6   : > { %s750_s10 = sadd.s32 4294967294, %s933_s30   ;;  %s1016_s11 = sadd.s32 1, %s933_s30  }
   0x7   : > { %s31_s12 = sadd.s32 1, %s929_s29  ;;  %s28_s13 = ssub.s32 %s933_s30, %s1016_s11 }
   0x8   : > { %p38_p0 = scmp.ne.s32.totalorder %s929_s29, %s925_s28  ;;  %p29_p1 = scmp.eq.s32.totalorder %s28_s13, 0 }
   0x9   : > { %p39_p2 = scmp.eq.s32.totalorder %s933_s30, 0  ;;  %p44_p3 = scmp.ne.s32.totalorder %s925_s28, %s921_s27 }
   0xa   : > { %p45_p4 = scmp.eq.s32.totalorder %s1012_s9, 0  ;;  %p215_p7 = scmp.eq.s32.totalorder %s1012_s9, 1 }
   0xb   : > { %s1028_s14 = scalar_select %p29_p1, %s929_s29, %s31_s12  }
   0xc   : > { %p1030_p5 = por %p39_p2, %p38_p0  ;;  %p1034_p6 = por %p45_p4, %p44_p3 }
   0xd   : > { %1220 = sst [smem:[#allocation9_spill]] %s1028_s14  ;;  %p221_p8 = scmp.eq.s32.totalorder %s750_s10, 1 }
   0xe   : > { %p789_p10 = scmp.lt.s32.totalorder %s933_s30, 2  ;;  %p1041_p11 = por %p215_p7, %p38_p0 }
   0xf   : > { %p1045_p12 = por %p221_p8, %p44_p3  ;;  %s262_s19 = sand.u32 1, %s929_s29  }
  0x10   : > { %s774_s20 = sshll.u32 %s933_s30, 4  ;;  %s753_s21 = sshll.u32 %s262_s19, 4 }
  0x11   : > { %s271_s24 = scalar_lea.hbm %s1209_s0, %s774_s20  ;;  %s266_s26 = scalar_lea.vmem [#allocation2], %s753_s21 }
  0x12   : > { %s273_s25 = sshll.u32 %s271_s24, 4  ;;  %s275_s10 = sshll.u32 %s266_s26, 4  ;;  %s274_s25 = int_to_ptr.hbm [resolvable:$true] %s273_s25  ;;  %s276_s10 = int_to_ptr.vmem [resolvable:$true] %s275_s10 }
  0x13   : > { %p1056_p13 = pnand %p789_p10, %p1030_p5  ;;  %p756_p0 = scmp.ge.s32.totalorder %s933_s30, 1 }
  0x14   : > { %p280_p1 = scmp.lt.s32.totalorder %s933_s30, 3  ;;  %s263_s13 = scalar_lea.sflag [#allocation3], %s262_s19 }
  0x15   : > { %s837_s14 = sshra.s32 %s274_s25, 4  ;;  %p841_p3 = pneg %p1056_p13  ;;  %s838_s14 = int_to_ptr.hbm [resolvable:$true] %s837_s14 }
  0x16   : > { %s839_s29 = scalar_lea.hbm %s838_s14, 16  ;;  %s844_s15 = scalar_lea.hbm %s1209_s0, 32 }
  0x17   : > { %p840_p2 = scmp.ne.s32.totalorder %s838_s14, %s839_s29  ;;  %p845_p5 = scmp.lt.s32.totalorder %s838_s14, %s1209_s0 }
  0x18   : > { %p846_p8 = scmp.lt.s32.totalorder %s844_s15, %s839_s29 }
  0x19   : > { %p842_p4 = pnand %p841_p3, %p840_p2 }
  0x1a   : > { %p847_p10 = por %p846_p8, %p845_p5 }
  0x1b   : > { %p843_p7 = pneg %p842_p4 }
  0x1d   : > { %p848_p9 = pnand %p847_p10, %p843_p7 }
  0x1f   : > { %851 = shalt.err (!%p848_p9)
}
  0x20   : > { %784 = dma.hbm_to_vmem [thread:$0]  (!%p1056_p13), %s274_s25, 256, %s276_s10, %s263_s13  }
  0x21   : > { %p281_p2 = pnand %p756_p0, %p280_p1 }
  0x22   : > { %s1077_s19 = sand.u32 (!%p281_p2), 1, %s925_s28  }
  0x23   : > { %284 = sbr.rel (%p281_p2) target bundleno = 630 (0x276), region = 52  ;;  %s757_s14 = sshll.u32 (!%p281_p2), %s1077_s19, 4 }
  0x24   : > { %s287_s29 = scalar_lea.sflag (!%p281_p2), [#allocation3], %s1077_s19  ;;  %s290_s24 = scalar_lea.vmem (!%p281_p2), [#allocation2], %s757_s14 }
  0x28   : > { %912 = dma.done.wait (%p1034_p6), %s287_s29, 256  }
  0x29   : > { %914 = vsyncadd (%p1034_p6), %s287_s29, 4294967040  ;;  %v935_v0 = vmov 0   ;;  %v1085_v1 = vld [vmem:[%s290_s24] sm:$0xff]  ;;  %vm342_vm0 = vcmask 1043456   ;;  %v1087_v2 = vld [vmem:[%s290_s24 + $0x8] sm:$0xff]  ;;  %vm338_vm1 = vcmask 64512   ;;  %v384_v20 = vlaneseq }
  0x2a   : > { %834 = vset.pattern.permute.xlu0 %v935_v0  ;;  %835 = vset.pattern.permute.xlu2 %v935_v0  ;;  %v329_v3 = vpack.c.bf16 %v1085_v1, %v1085_v1  ;;  %v330_v4 = vpack.c.bf16 %v1087_v2, %v1087_v2  ;;  %v332_v5 = vld [vmem:[%s1214_s5] sm:$0xff]  ;;  %s936_s12 = smov 113   ;;  %s937_s13 = smov 111   ;;  %v1118_v24 = vld [vmem:[%s1210_s1 + $0x8] sm:$0xff]  ;;  %vm562_vm10 = vcmask 588800   ;;  %vm621_vm11 = vcmask 130048  }
  0x2b   : > { %836 = vset.pattern.permute.xlu1 %v935_v0  ;;  %335 = vperm.xlu0 %834, %v332_v5   ;;  %v331_v8 = vld [vmem:[%s1211_s2] sm:$0xf]  ;;  %s938_s20 = smov 112   ;;  %s939_s21 = smov 127   ;;  %v1108_v22 = vand.u32 127, %v384_v20  ;;  %v474_v26 = vperm.slane %v1118_v24, 7 }
  0x2c   : > { %v344_v6 = vsel %vm342_vm0, %v329_v3, 0  ;;  %v347_v7 = vsel %vm342_vm0, %v330_v4, 0  ;;  %s940_s15 = smov 15   ;;  %s941_s22 = smov 1   ;;  %v604_v19 = vld [vmem:[%s1216_s7] sm:$0xff]  ;;  %v450_v36 = vperm.slane %v1118_v24, 5 }
  0x2d   : > { %356 = vmatpush.bf16.msra.mxu0 %v344_v6  ;;  %369 = vmatpush.bf16.msra.mxu1 %v347_v7  ;;  %s942_s23 = smov 17   ;;  %s943_s14 = smov 16   ;;  %v1113_v23 = vld [vmem:[%s1210_s1] sm:$0xff]  ;;  %vm470_vm2 = vcmp.lt.s32.totalorder %v1108_v22, 111  ;;  %vm446_vm3 = vcmp.lt.s32.totalorder %v1108_v22, 113  ;;  %vm458_vm4 = vcmp.lt.s32.totalorder %v1108_v22, 112 }
  0x2e   : > { %v473_v25 = vperm.slane %v1113_v23, 7  ;;  %v449_v35 = vperm.slane %v1113_v23, 5  ;;  %v461_v37 = vperm.slane %v1113_v23, 6  ;;  %v462_v38 = vperm.slane %v1118_v24, 6  ;;  %s758_s24 = sshll.u32 %s1077_s19, 5  ;;  %s776_s25 = sshll.u32 %s1012_s9, 4 }
  0x2f   : > { %vm434_vm5 = vcmp.lt.s32.totalorder %v1108_v22, 127  ;;  %v437_v58 = vperm.slane %v1113_v23, 4  ;;  %v438_v59 = vperm.slane %v1118_v24, 4  ;;  %vm410_vm6 = vcmp.lt.s32.totalorder %v1108_v22, 15  ;;  %s323_s26 = scalar_lea.vmem [#allocation5], %s758_s24  ;;  %s662_s9 = scalar_lea.sflag [#allocation4], %s1077_s19 }
  0x30   : > { %759 = vmatmul.msk.bf16.vlgmr.msra.gmra.mxu0 %vm338_vm1, %v331_v8  ;;  %760 = vmatmul.msk.bf16.vlgmr.msra.gmra.mxu1 %vm338_vm1, %v331_v8  ;;  %v414_v20 = vperm.slane %v1118_v24, 2  ;;  %vm422_vm7 = vcmp.lt.s32.totalorder %v1108_v22, 1  ;;  %vm386_vm8 = vcmp.lt.s32.totalorder %v1108_v22, 17  ;;  %vm398_vm9 = vcmp.lt.s32.totalorder %v1108_v22, 16  ;;  %s887_s29 = scalar_lea.hbm %s1217_s8, 64 }
  0x9d   : > { %v336_v9 = vpop.permute.xlu0 %335 }
  0xad   : > { %v358_v10 = vpop.f32.mrf.mxu0  ;;  %v371_v11 = vpop.f32.mrf.mxu1 }
  0xae   : > { %v359_v12 = vadd.f32 %v358_v10, %v336_v9  ;;  %v372_v13 = vadd.f32 %v371_v11, %v336_v9 }
  0xb0   : > { %v375_v14 = vmax.f32 %v359_v12, 0.0  ;;  %v376_v15 = vmax.f32 %v372_v13, 0.0 }
  0xb2   : > { %444 = vrot.lane.b32.xlu2 %v376_v15, %s936_s12  ;;  %468 = vrot.lane.b32.xlu1 %v376_v15, %s937_s13  ;;  %v1101_v16 = vpack.c.bf16 %v376_v15, %v375_v14 }
  0xb3   : > { %466 = vrot.lane.b32.xlu0 %v375_v14, %s937_s13  ;;  %s674_s13 = sshll.u32 %s323_s26, 4  ;;  %s675_s13 = int_to_ptr.vmem [resolvable:$true] %s674_s13 }
  0xb5   : > { %v360_v17 = vpop.f32.mrf.mxu0  ;;  %v373_v18 = vpop.f32.mrf.mxu1 }
  0xb6   : > { %v500_v17 = vunpack.c.h.b16 %v1101_v16 }
  0xba   : > { %454 = vrot.lane.b32.xlu2 %v375_v14, %s938_s20  ;;  %442 = vrot.lane.b32.xlu1 %v375_v14, %s936_s12  ;;  %s673_s12 = scalar_lea.hbm %s1217_s8, %s776_s25 }
  0xbb   : > { %456 = vrot.lane.b32.xlu0 %v376_v15, %s938_s20  ;;  %s676_s20 = sshll.u32 %s673_s12, 4  ;;  %s677_s20 = int_to_ptr.hbm [resolvable:$true] %s676_s20 }
  0xc2   : > { %432 = vrot.lane.b32.xlu2 %v376_v15, %s939_s21  ;;  %430 = vrot.lane.b32.xlu1 %v375_v14, %s939_s21  ;;  %s881_s21 = sshra.s32 %s677_s20, 4  ;;  %s882_s21 = int_to_ptr.hbm [resolvable:$true] %s881_s21 }
  0xc3   : > { %406 = vrot.lane.b32.xlu0 %v375_v14, %s940_s15  ;;  %p888_p0 = scmp.lt.s32.totalorder %s882_s21, %s1217_s8 }
  0xca   : > { %418 = vrot.lane.b32.xlu2 %v375_v14, %s941_s22  ;;  %408 = vrot.lane.b32.xlu1 %v376_v15, %s940_s15  ;;  %s883_s15 = scalar_lea.hbm %s882_s21, 32 }
  0xcb   : > { %420 = vrot.lane.b32.xlu0 %v376_v15, %s941_s22  ;;  %p884_p6 = scmp.ne.s32.totalorder %s882_s21, %s883_s15  ;;  %p889_p1 = scmp.lt.s32.totalorder %s887_s29, %s883_s15 }
  0xcd   : > { %p885_p9 = pnand %p884_p6, %p1041_p11  ;;  %p890_p3 = por %p889_p1, %p888_p0 }
  0xcf   : > { %p886_p13 = pneg %p885_p9 }
  0xd1   : > { %p891_p4 = pnand %p890_p3, %p886_p13 }
  0xd2   : > { %382 = vrot.lane.b32.xlu2 %v376_v15, %s942_s23  ;;  %380 = vrot.lane.b32.xlu1 %v375_v14, %s942_s23 }
  0xd3   : > { %394 = vrot.lane.b32.xlu0 %v375_v14, %s943_s14 }
  0xda   : > { %396 = vrot.lane.b32.xlu1 %v376_v15, %s943_s14  ;;  %v499_v15 = vunpack.c.l.b16 %v1101_v16 }
  0xdb   : > { %608 = vperm.xlu0 %834, %v604_v19   ;;  %v413_v19 = vperm.slane %v1113_v23, 2 }
 0x10c   : > { %v445_v21 = vpop.permute.xlu2 %444 }
 0x114   : > { %v455_v29 = vpop.permute.xlu2 %454 }
 0x11c   : > { %v433_v55 = vpop.permute.xlu2 %432 }
 0x124   : > { %v469_v27 = vpop.permute.xlu1 %468  ;;  %v419_v18 = vpop.permute.xlu2 %418 }
 0x125   : > { %v467_v28 = vpop.permute.xlu0 %466 }
 0x126   : > { %v471_v30 = vsel %vm470_vm2, %v467_v28, %v469_v27  ;;  %v472_v31 = vsel %vm470_vm2, %v469_v27, %v467_v28  ;;  %v425_v27 = vperm.slane %v1113_v23, 3  ;;  %v426_v28 = vperm.slane %v1118_v24, 3 }
 0x127   : > { %v475_v32 = vmul.f32 %v473_v25, %v471_v30  ;;  %v476_v33 = vmul.f32 %v474_v26, %v472_v31  ;;  %v556_v26 = vld [vmem:[%s1215_s6] sm:$0xff] }
 0x128   : > { %559 = vperm.xlu2 %835, %v556_v26  }
 0x129   : > { %v477_v34 = vpack.c.bf16 %v476_v33, %v475_v32 }
 0x12b   : > { %v519_v39 = vunpack.c.l.b16 %v477_v34  ;;  %v520_v40 = vunpack.c.h.b16 %v477_v34  ;;  %v501_v34 = vpack.c.b16 %v499_v15, %v499_v15 }
 0x12c   : > { %v443_v41 = vpop.permute.xlu1 %442 }
 0x12d   : > { %v447_v42 = vsel %vm446_vm3, %v443_v41, %v445_v21  ;;  %v448_v43 = vsel %vm446_vm3, %v445_v21, %v443_v41  ;;  %v457_v44 = vpop.permute.xlu0 %456  ;;  %v521_v45 = vpack.c.b16 %v519_v39, %v519_v39  ;;  %v522_v46 = vpack.c.b16 %v520_v40, %v520_v40 }
 0x12e   : > { %v451_v47 = vmul.f32 %v449_v35, %v447_v42  ;;  %v452_v48 = vmul.f32 %v450_v36, %v448_v43  ;;  %v459_v49 = vsel %vm458_vm4, %v455_v29, %v457_v44  ;;  %v460_v50 = vsel %vm458_vm4, %v457_v44, %v455_v29 }
 0x12f   : > { %v463_v51 = vmul.f32 %v461_v37, %v459_v49  ;;  %v464_v52 = vmul.f32 %v462_v38, %v460_v50  ;;  %v567_v53 = vsel %vm342_vm0, %v521_v45, 0  ;;  %v570_v54 = vsel %vm342_vm0, %v522_v46, 0  ;;  %v383_v50 = vpop.permute.xlu2 %382 }
 0x130   : > { %v453_v56 = vpack.c.bf16 %v452_v48, %v451_v47  ;;  %575 = vmatpush.bf16.msra.mxu2 %v567_v53  ;;  %588 = vmatpush.bf16.msra.mxu3 %v570_v54  ;;  %v502_v35 = vpack.c.b16 %v500_v17, %v500_v17 }
 0x131   : > { %v465_v57 = vpack.c.bf16 %v464_v52, %v463_v51  ;;  %v389_v51 = vperm.slane %v1113_v23, 0  ;;  %v390_v52 = vperm.slane %v1118_v24, 0 }
 0x132   : > { %v509_v60 = vunpack.c.l.b16 %v453_v56  ;;  %v510_v61 = vunpack.c.h.b16 %v453_v56 }
 0x133   : > { %v514_v62 = vunpack.c.l.b16 %v465_v57  ;;  %v515_v63 = vunpack.c.h.b16 %v465_v57 }
 0x134   : > { %v431_v0 = vpop.permute.xlu1 %430  ;;  %v511_v3 = vpack.c.b16 %v509_v60, %v509_v60  ;;  %v512_v4 = vpack.c.b16 %v510_v61, %v510_v61 }
 0x135   : > { %v435_v5 = vsel %vm434_vm5, %v431_v0, %v433_v55  ;;  %v436_v6 = vsel %vm434_vm5, %v433_v55, %v431_v0  ;;  %v407_v7 = vpop.permute.xlu0 %406  ;;  %v516_v8 = vpack.c.b16 %v514_v62, %v514_v62  ;;  %v517_v9 = vpack.c.b16 %v515_v63, %v515_v63 }
 0x136   : > { %v439_v10 = vmul.f32 %v437_v58, %v435_v5  ;;  %v440_v11 = vmul.f32 %v438_v59, %v436_v6  ;;  %v401_v0 = vperm.slane %v1113_v23, 1 }
 0x137   : > { %v549_v12 = vsel %vm342_vm0, %v511_v3, %v516_v8  ;;  %v553_v13 = vsel %vm342_vm0, %v512_v4, %v517_v9  ;;  %v402_v3 = vperm.slane %v1118_v24, 1 }
 0x138   : > { %v441_v14 = vpack.c.bf16 %v440_v11, %v439_v10  ;;  %576 = vmatpush.bf16.msra.mxu2 %v549_v12  ;;  %589 = vmatpush.bf16.msra.mxu3 %v553_v13 }
 0x13a   : > { %v504_v21 = vunpack.c.l.b16 %v441_v14  ;;  %v505_v25 = vunpack.c.h.b16 %v441_v14 }
 0x13c   : > { %v409_v29 = vpop.permute.xlu1 %408  ;;  %v506_v16 = vpack.c.b16 %v504_v21, %v504_v21  ;;  %v507_v30 = vpack.c.b16 %v505_v25, %v505_v25  ;;  %v605_v21 = vld [vmem:[%s1216_s7 + $0x8] sm:$0xff] }
 0x13d   : > { %v411_v31 = vsel %vm410_vm6, %v407_v7, %v409_v29  ;;  %v412_v32 = vsel %vm410_vm6, %v409_v29, %v407_v7  ;;  %v421_v33 = vpop.permute.xlu0 %420  ;;  %613 = vperm.xlu1 %836, %v605_v21  }
 0x13e   : > { %v415_v36 = vmul.f32 %v413_v19, %v412_v32  ;;  %v416_v37 = vmul.f32 %v414_v20, %v411_v31  ;;  %v423_v38 = vsel %vm422_vm7, %v419_v18, %v421_v33  ;;  %v424_v39 = vsel %vm422_vm7, %v421_v33, %v419_v18  ;;  %v555_v20 = vld [vmem:[%s1212_s3] sm:$0xf] }
 0x13f   : > { %v427_v40 = vmul.f32 %v425_v27, %v424_v39  ;;  %v428_v41 = vmul.f32 %v426_v28, %v423_v38  ;;  %v541_v42 = vsel %vm342_vm0, %v501_v34, %v506_v16  ;;  %v545_v43 = vsel %vm342_vm0, %v502_v35, %v507_v30  ;;  %v775_v33 = vld [vmem:[%s1213_s4] sm:$0xff] }
 0x140   : > { %v417_v44 = vpack.c.bf16 %v416_v37, %v415_v36  ;;  %577 = vmatpush.bf16.msra.mxu2 %v541_v42  ;;  %590 = vmatpush.bf16.msra.mxu3 %v545_v43 }
 0x141   : > { %v429_v45 = vpack.c.bf16 %v428_v41, %v427_v40 }
 0x142   : > { %v489_v46 = vunpack.c.l.b16 %v417_v44  ;;  %v490_v47 = vunpack.c.h.b16 %v417_v44 }
 0x143   : > { %v494_v48 = vunpack.c.l.b16 %v429_v45  ;;  %v495_v49 = vunpack.c.h.b16 %v429_v45 }
 0x144   : > { %v381_v53 = vpop.permute.xlu1 %380  ;;  %v491_v54 = vpack.c.b16 %v489_v46, %v489_v46  ;;  %v492_v55 = vpack.c.b16 %v490_v47, %v490_v47 }
 0x145   : > { %v387_v56 = vsel %vm386_vm8, %v381_v53, %v383_v50  ;;  %v388_v57 = vsel %vm386_vm8, %v383_v50, %v381_v53  ;;  %v496_v58 = vpack.c.b16 %v494_v48, %v494_v48  ;;  %v497_v59 = vpack.c.b16 %v495_v49, %v495_v49  ;;  %v395_v5 = vpop.permute.xlu0 %394 }
 0x146   : > { %v391_v62 = vmul.f32 %v389_v51, %v388_v57  ;;  %v392_v63 = vmul.f32 %v390_v52, %v387_v56 }
 0x147   : > { %v533_v60 = vsel %vm342_vm0, %v491_v54, %v496_v58  ;;  %v537_v61 = vsel %vm342_vm0, %v492_v55, %v497_v59 }
 0x148   : > { %578 = vmatpush.bf16.msra.mxu2 %v533_v60  ;;  %591 = vmatpush.bf16.msra.mxu3 %v537_v61  ;;  %v393_v4 = vpack.c.bf16 %v392_v63, %v391_v62 }
 0x14a   : > { %v479_v12 = vunpack.c.l.b16 %v393_v4  ;;  %v480_v13 = vunpack.c.h.b16 %v393_v4 }
 0x14c   : > { %v397_v6 = vpop.permute.xlu1 %396  ;;  %v481_v17 = vpack.c.b16 %v479_v12, %v479_v12  ;;  %v482_v19 = vpack.c.b16 %v480_v13, %v480_v13 }
 0x14d   : > { %v399_v7 = vsel %vm398_vm9, %v395_v5, %v397_v6  ;;  %v400_v8 = vsel %vm398_vm9, %v397_v6, %v395_v5  ;;  %v609_v36 = vpop.permute.xlu0 %608 }
 0x14e   : > { %v403_v9 = vmul.f32 %v401_v0, %v400_v8  ;;  %v404_v10 = vmul.f32 %v402_v3, %v399_v7 }
 0x150   : > { %v405_v11 = vpack.c.bf16 %v404_v10, %v403_v9 }
 0x152   : > { %v484_v14 = vunpack.c.l.b16 %v405_v11  ;;  %v485_v15 = vunpack.c.h.b16 %v405_v11 }
 0x154   : > { %v486_v18 = vpack.c.b16 %v484_v14, %v484_v14  ;;  %v487_v22 = vpack.c.b16 %v485_v15, %v485_v15 }
 0x156   : > { %v525_v23 = vsel %vm342_vm0, %v481_v17, %v486_v18  ;;  %v529_v24 = vsel %vm342_vm0, %v482_v19, %v487_v22 }
 0x157   : > { %579 = vmatpush.bf16.msra.mxu2 %v525_v23  ;;  %592 = vmatpush.bf16.msra.mxu3 %v529_v24 }
 0x15a   : > { %761 = vmatmul.msk.bf16.vlgmr.msra.gmra.mxu2 %vm562_vm10, %v555_v20  ;;  %762 = vmatmul.msk.bf16.vlgmr.msra.gmra.mxu3 %vm562_vm10, %v555_v20 }
 0x182   : > { %v560_v25 = vpop.permute.xlu2 %559 }
 0x1af   : > { %v614_v41 = vpop.permute.xlu1 %613 }
 0x1dd   : > { %v581_v26 = vpop.f32.mrf.mxu2  ;;  %v594_v27 = vpop.f32.mrf.mxu3 }
 0x1de   : > { %v582_v28 = vadd.f32 %v581_v26, %v560_v25  ;;  %v595_v29 = vadd.f32 %v594_v27, %v560_v25 }
 0x1e0   : > { %v598_v16 = vmax.f32 %v582_v28, 0.0  ;;  %v599_v30 = vmax.f32 %v595_v29, 0.0 }
 0x1e2   : > { %v600_v31 = vpack.c.bf16 %v1085_v1, %v598_v16  ;;  %v601_v32 = vpack.c.bf16 %v1087_v2, %v599_v30 }
 0x1e4   : > { %632 = vmatpush.bf16.msrb.mxu0 %v600_v31  ;;  %646 = vmatpush.bf16.msrb.mxu1 %v601_v32 }
 0x1e5   : > { %v583_v34 = vpop.f32.mrf.mxu2  ;;  %v596_v35 = vpop.f32.mrf.mxu3 }
 0x1e7   : > { %767 = vmatmul.msk.bf16.vlgmr.msrb.gmra.mxu0 %vm621_vm11, %v775_v33  ;;  %768 = vmatmul.msk.bf16.vlgmr.msrb.gmra.mxu1 %vm621_vm11, %v775_v33 }
 0x264   : > { %v634_v37 = vpop.f32.mrf.mxu0  ;;  %v648_v38 = vpop.f32.mrf.mxu1 }
 0x265   : > { %v635_v39 = vadd.f32 %v634_v37, %v609_v36  ;;  %v649_v1 = vadd.f32 %v648_v38, %v609_v36 }
 0x267   : > { %v653_v40 = vmax.f32 %v635_v39, 0.0  ;;  %v654_v2 = vmax.f32 %v649_v1, 0.0 }
 0x269   : > { %657 = vst [vmem:[%s323_s26] sm:$0xff] %v653_v40 }
 0x26a   : > { %658 = vst [vmem:[%s323_s26 + $0x8] sm:$0xff] %v654_v2 }
 0x26c   : > { %v636_v42 = vpop.f32.mrf.mxu0  ;;  %v650_v43 = vpop.f32.mrf.mxu1 }
 0x26d   : > { %v637_v44 = vadd.f32 %v636_v42, %v614_v41  ;;  %v651_v45 = vadd.f32 %v650_v43, %v614_v41 }
 0x26f   : > { %v655_v46 = vmax.f32 %v637_v44, 0.0  ;;  %v656_v47 = vmax.f32 %v651_v45, 0.0 }
 0x271   : > { %659 = vst [vmem:[%s323_s26 + $0x10] sm:$0xff] %v655_v46 }
 0x272   : > { %660 = vst [vmem:[%s323_s26 + $0x18] sm:$0xff] %v656_v47 }
 0x273   : > { %894 = shalt.err (!%p891_p4)
}
 0x274   : > { %s944_s19 = smov 256   ;;  %s945_s26 = smov 512  }
 0x275   : > { %779 = dma.vmem_to_hbm [thread:$0]  (%p1041_p11), %s675_s13, 512, %s677_s20, %s662_s9, %s944_s19, %s945_s26, %s943_s14  }
 0x276 PF: > { %s691_s16 = sand.u32 1, %s921_s27   ;;  %p1226_p7 = scmp.ge.s32.totalorder %s933_s30, 2 }
 0x277   : > { %s692_s10 = scalar_lea.sflag [#allocation4], %s691_s16 }
 0x278   : > { %p786_p5 = pnand %p1226_p7, %p1045_p12 }
 0x27a   : > { %p787_p8 = pneg %p786_p5 }
 0x27c   : > { %916 = dma.done.wait (%p787_p8), %s692_s10, 512  }
 0x27d   : > { %918 = vsyncadd (%p787_p8), %s692_s10, 4294966784  ;;  %s1227_s12 = sld [smem:[#allocation8_spill]]  ;;  %p21_p10 = scmp.ge.s32.totalorder %s1016_s11, 4  }
 0x27e   : > { %s1228_s29 = sld [smem:[#allocation9_spill]]  ;;  %s1229_s27 = smov %s925_s28 }
 0x27f   : > { %s1231_s30 = smov %s1016_s11  ;;  %23 = sbr.rel (!%p21_p10) target bundleno = 5 (0x5), region = 97 }
 0x283   : > { %s1230_s28 = smov %s1227_s12 }
 0x284   :  { %698 = vsyncpa [#allocation3], 1 }
 0x285   :  { %700 = vsyncpa [#allocation3 + $0x1], 1 }
 0x286   :  { %701 = vsyncpa [#allocation4], 1 }
 0x287   :  { %703 = vsyncpa [#allocation4 + $0x1], 1 }

</bundles_post_ra>
